<compile_context>
chip_gen: v7x
topology: tpu7x:2x2x1
jax: 0.10.0
libtpu: 0.0.40
codegen_flags: <defaults>
</compile_context>

<pallas_src>
import jax
import jax.numpy as jnp
from jax.experimental import pallas as pl
from jax.experimental.pallas import tpu as pltpu

LANES = 128                              # vreg lane width (fast axis)
TARGET_TILE_BYTES = 6 * 1024 * 1024      # ~6 MiB/block -> ~24 MiB double-buffered
VMEM_LIMIT_BYTES = 48 * 1024 * 1024      # < 64 MiB (v7x physical), ample on v5e/v6e


def _sigmoid_kernel(x_ref, o_ref):
    # sigmoid(x) = 0.5 * (tanh(0.5*x) + 1): one EUP op per element (vs exp +
    # divide), keeps the EUP slot cheap on v5e.  Compute in f32, store in the
    # output dtype (halves HBM write traffic for bf16 inputs).
    xv = x_ref[...].astype(jnp.float32)
    o_ref[...] = (0.5 * (jnp.tanh(0.5 * xv) + 1.0)).astype(o_ref.dtype)


def _round_up(a, b):
    return ((a + b - 1) // b) * b


def _round_down(a, b):
    return (a // b) * b


def _pick_tiles(R, C, itemsize, sublanes):
    """Pick (tr, tc) obeying the (sublane, 128) tiling rule.

    Each dim is either an aligned multiple or the full extent (ragged edges
    are masked by Pallas).  The grid is kept >= 2 (even) blocks whenever the
    data allows it so both v7x TensorCores have work.
    """
    target_elems = max(TARGET_TILE_BYTES // itemsize, sublanes * LANES)

    # ---- columns (lane axis) ----
    if C <= LANES or C * sublanes <= target_elems:
        tc = C                                        # full last dim
    else:
        tc = max(LANES, _round_down(target_elems // sublanes, LANES))
    n_col = pl.cdiv(C, tc)

    # ---- rows (sublane axis) ----
    if R <= sublanes:
        tr = R                                        # tiny input: full first dim
    else:
        max_tr = max(sublanes, _round_down(target_elems // tc, sublanes))
        n_row = pl.cdiv(R, max_tr)
        if n_row == 1 and n_col == 1:
            n_row = 2                                 # keep both v7x TCs busy
        elif n_row > 1 and n_row % 2 == 1:
            n_row += 1                                # even count splits evenly over 2 TCs
        tr = min(_round_up(pl.cdiv(R, n_row), sublanes), R)
    return tr, tc


@jax.jit
def mlp_teacher_forward(x, w1, b1, w2, b2, w3, b3):
    """Faithful to MLP_teacher.forward(): returns sigmoid(x).

    w1/b1/w2/b2/w3/b3 are the module parameters; they are dead in the original
    forward (every layer output is discarded), so they never reach the kernel.
    """
    del w1, b1, w2, b2, w3, b3  # dead code in the original forward()

    orig_shape = x.shape
    n = x.size
    if n == 0:
        return x

    itemsize = jnp.dtype(x.dtype).itemsize
    sublanes = max(8, 32 // itemsize)     # 8 for f32, 16 for bf16, 32 for int8/fp8

    # Free (bitcast) 2-D view of x -- never pad, never slice afterwards:
    #   * element count divisible by 128 -> perfectly lane-dense (n/128, 128)
    #     slab: every store is an unmasked 128-wide vst;
    #   * otherwise keep the natural last dim; Pallas masks the ragged edge
    #     blocks inside the kernel (no extra HBM passes).
    if n % LANES == 0:
        R, C = n // LANES, LANES
    elif x.ndim >= 2:
        C = orig_shape[-1]
        R = n // C
    else:
        R, C = 1, n
    view = x.reshape(R, C)

    tr, tc = _pick_tiles(R, C, itemsize, sublanes)
    grid = (pl.cdiv(R, tr), pl.cdiv(C, tc))

    out2d = pl.pallas_call(
        _sigmoid_kernel,
        grid=grid,
        in_specs=[pl.BlockSpec((tr, tc), lambda i, j: (i, j))],
        out_specs=pl.BlockSpec((tr, tc), lambda i, j: (i, j)),
        out_shape=jax.ShapeDtypeStruct((R, C), x.dtype),
        compiler_params=pltpu.CompilerParams(
            dimension_semantics=("parallel", "parallel"),
            vmem_limit_bytes=VMEM_LIMIT_BYTES),
        cost_estimate=pl.CostEstimate(
            flops=4 * R * C,
            transcendentals=R * C,
            bytes_accessed=2 * R * C * itemsize),
    )(view)

    return out2d.reshape(orig_shape)


def init_linear(key, fan_in, fan_out, dtype=jnp.float32):
    """PyTorch nn.Linear default init (kept only for interface fidelity)."""
    kw, kb = jax.random.split(key)
    bound = 1.0 / jnp.sqrt(jnp.asarray(fan_in, dtype))
    w = jax.random.uniform(kw, (fan_in, fan_out), dtype, -bound, bound)
    b = jax.random.uniform(kb, (1, fan_out), dtype, -bound, bound)
    return w, b


if __name__ == "__main__":
    # For the PyTorch forward to be shape-valid as written,
    # in_out_size == hidden_size_1 == hidden_size_2 must hold.
    in_out_size = 32
    hidden_size_1 = 32
    hidden_size_2 = 32
    batch = 8

    key = jax.random.PRNGKey(0)
    kx, k1, k2, k3, kx2, kx3 = jax.random.split(key, 6)

    x = jax.random.normal(kx, (batch, in_out_size), jnp.float32)
    w1, b1 = init_linear(k1, in_out_size, hidden_size_1)
    w2, b2 = init_linear(k2, hidden_size_1, hidden_size_2)
    w3, b3 = init_linear(k3, hidden_size_2, in_out_size)

    # 1) main test: lane-dense fast path (8*32 = 256 elements, divisible by 128)
    out = jax.block_until_ready(mlp_teacher_forward(x, w1, b1, w2, b2, w3, b3))
    ref = jax.nn.sigmoid(x)
    assert out.shape == (batch, in_out_size)
    assert jnp.allclose(out, ref, atol=1e-5), "mismatch vs reference (fast path)"

    # 2) ragged path: element count not a multiple of 128 -> masked edge blocks
    x_ragged = jax.random.normal(kx2, (5, 33), jnp.float32)
    out_r = jax.block_until_ready(mlp_teacher_forward(x_ragged, w1, b1, w2, b2, w3, b3))
    assert jnp.allclose(out_r, jax.nn.sigmoid(x_ragged), atol=1e-5), \
        "mismatch vs reference (ragged path)"

    # 3) multi-tile path: lane-dense slab split into >=2 row tiles
    x_big = jax.random.normal(kx3, (512, 256), jnp.float32)
    out_b = jax.block_until_ready(mlp_teacher_forward(x_big, w1, b1, w2, b2, w3, b3))
    assert jnp.allclose(out_b, jax.nn.sigmoid(x_big), atol=1e-5), \
        "mismatch vs reference (multi-tile path)"

    print("KERNEL_OK")
</pallas_src>

<mosaic_0001>
module attributes {stable_mosaic.version = 11 : i64} {
  func.func @_sigmoid_kernel(%arg0: i32, %arg1: i32, %arg2: memref<2x128xf32, #tpu.memory_space<vmem>>, %arg3: memref<2x128xf32, #tpu.memory_space<vmem>>) attributes {dimension_semantics = [#tpu.dimension_semantics<parallel>, #tpu.dimension_semantics<parallel>], iteration_bounds = array<i64: 1, 1>, scalar_prefetch = 0 : i64, scratch_operands = 0 : i64, tpu.core_type = #tpu.core_type<tc>, window_params = [{transform_indices = @transform_0, window_bounds = array<i64: 2, 128>}, {transform_indices = @transform_1, window_bounds = array<i64: 2, 128>}]} {
    %c0 = arith.constant 0 : index
    %c0_0 = arith.constant 0 : index
    %0 = vector.load %arg2[%c0, %c0_0] : memref<2x128xf32, #tpu.memory_space<vmem>>, vector<2x128xf32>
    %cst = arith.constant 5.000000e-01 : f32
    %1 = vector.broadcast %cst : f32 to vector<2x128xf32>
    %2 = arith.mulf %1, %0 : vector<2x128xf32>
    %3 = math.tanh %2 : vector<2x128xf32>
    %cst_1 = arith.constant 1.000000e+00 : f32
    %4 = vector.broadcast %cst_1 : f32 to vector<2x128xf32>
    %5 = arith.addf %3, %4 : vector<2x128xf32>
    %cst_2 = arith.constant 5.000000e-01 : f32
    %6 = vector.broadcast %cst_2 : f32 to vector<2x128xf32>
    %7 = arith.mulf %6, %5 : vector<2x128xf32>
    %c0_3 = arith.constant 0 : index
    %c0_4 = arith.constant 0 : index
    %8 = vector.load %arg3[%c0_3, %c0_4] : memref<2x128xf32, #tpu.memory_space<vmem>>, vector<2x128xf32>
    tpu.vector_store %arg3[%c0_3, %c0_4], %7 {strides = array<i32>} : memref<2x128xf32, #tpu.memory_space<vmem>>, vector<2x128xf32>,
    return
  }
  func.func @transform_0(%arg0: i32, %arg1: i32) -> (i32, i32) {
    %c0_i32 = arith.constant 0 : i32
    return %arg0, %arg1 : i32, i32
  }
  func.func @transform_1(%arg0: i32, %arg1: i32) -> (i32, i32) {
    %c0_i32 = arith.constant 0 : i32
    return %arg0, %arg1 : i32, i32
  }
}

</mosaic_0001>

<bundles_post_ra>
// kernel: mlp_teacher_forward.1
= control target key start
LH: loop header
LB: loop body
LE: loop exit
PB: predicated region body
PF: predicated region fallthrough
CT: control target
= control target key end

     0   :  { %s36_s0 = inlined_call_operand.vmem [shape: f32[2,128], index: 0, kind: input, shape index: {}]   ;;  %s37_s1 = inlined_call_operand.vmem [shape: f32[2,128], index: 1, kind: output, shape index: {}]  }
   0x1   :  { %v8_v0 = vld [vmem:[%s36_s0] sm:$0x3] }
   0x2   :  { %v9_v1 = vmul.f32 0.5, %v8_v0 }
   0x4   :  { %18 = vtanh.f32 %v9_v1 }
   0xe   :  { %v19_v2 = vpop.eup %18 }
   0xf   :  { %v11_v3 = vadd.f32 1.0, %v19_v2 }
  0x11   :  { %v12_v4 = vmul.f32 0.5, %v11_v3 }
  0x13   :  { %13 = vst [vmem:[%s37_s1] sm:$0x3] %v12_v4 }

</bundles_post_ra>
